<compile_context>
chip_gen: v6e
topology: v6e:2x2x1
jax: 0.10.0
libtpu: 0.0.40
codegen_flags: <defaults>
</compile_context>

<pallas_src>
import functools

import numpy as np
import jax
import jax.numpy as jnp
from jax import lax
from jax.experimental import pallas as pl
from jax.experimental.pallas import tpu as pltpu


# ----------------------------- static index folding -----------------------------------

def _reflect_index(i, size):
    """nn.ReflectionPad2d index semantics (edge not duplicated); valid for pad <= size-1."""
    if i < 0:
        i = -i
    if i >= size:
        i = 2 * size - 2 - i
    return i


def _source_index(out_pos, tap, pad, up_size, upsample):
    """Map an output position + conv tap to a row/col of the ORIGINAL (pre-upsample) input."""
    p = out_pos + tap - pad                # position in the (unpadded) upsampled image
    p = _reflect_index(p, up_size)         # reflection padding
    return p // upsample                   # nearest-neighbour upsample, integer factor


# ----------------------------------- kernel -------------------------------------------

def _upsample_conv_kernel(x_ref, bt_ref, ft_ref, bias_ref, o_ref, *, k, wo, cth):
    # x_ref:    (1, W, Cin*H)                 one image, width on sublanes, Cin*H on lanes
    # bt_ref:   (K*Wo, W)                     stacked one-hot column selection (upsample+pad+stride folded)
    # ft_ref:   (1, K, Cin*H, Cout*tile_h)    conv weights folded with the row selection for this row tile
    # bias_ref: (1, Cout*tile_h)              bias broadcast over output rows of the tile
    # o_ref:    (1, 1, Wo, Cout*tile_h)       lane-dense output slab (NCHW permute done in the wrapper)
    xt = x_ref[0]                                                       # (W, Cin*H)
    # One stacked selection matmul: picks x[c, h, src_w[kw, j]] for all (kw, j) at once.
    sel = jnp.dot(bt_ref[...], xt, preferred_element_type=jnp.float32)  # (K*Wo, Cin*H)
    # Bias folded into the accumulator init (no separate epilogue pass).
    acc = jnp.broadcast_to(bias_ref[...], (wo, cth)).astype(jnp.float32)
    for kw in range(k):
        acc = acc + jnp.dot(sel[kw * wo:(kw + 1) * wo, :], ft_ref[0, kw],
                            preferred_element_type=jnp.float32)         # (Wo, Cout*tile_h)
    o_ref[0, 0] = acc.astype(o_ref.dtype)                               # single contiguous slab store


# ----------------------------------- wrapper ------------------------------------------

def upsample_conv_layer(x, weight, bias, *, kernel_size, stride, upsample=None, tile_h=None):
    """Forward pass of the PyTorch UpsampleConvLayer.

    x:      (N, Cin, H, W)       NCHW
    weight: (Cout, Cin, K, K)    PyTorch nn.Conv2d layout
    bias:   (Cout,)
    returns (N, Cout, Ho, Wo)    NCHW
    """
    n, cin, h, w = x.shape
    cout = weight.shape[0]
    k = int(kernel_size)
    s = int(stride)
    u = int(upsample) if upsample else 1
    pad = k // 2
    hu, wu = h * u, w * u
    ho = (hu + 2 * pad - k) // s + 1
    wo = (wu + 2 * pad - k) // s + 1

    if tile_h is None:
        # Biggest tile (fewest grid steps).  When N == 1, split rows in two so v7x's
        # two TensorCores both get a parallel block; on v5e/v6e the extra step is cheap.
        tile_h = ho if (n >= 2 or ho % 2 != 0) else ho // 2
    assert ho % tile_h == 0, (ho, tile_h)
    n_t = ho // tile_h
    cth = cout * tile_h

    # -------- static source-index maps: upsample + reflection pad + tap offset + stride ----
    src_h = np.array([[_source_index(i * s, kh, pad, hu, u) for i in range(ho)]
                      for kh in range(k)], dtype=np.int64)              # (K, Ho)
    src_w = np.array([[_source_index(j * s, kw, pad, wu, u) for j in range(wo)]
                      for kw in range(k)], dtype=np.int64)              # (K, Wo)

    # Stacked column-selection matrix: row kw*Wo + j picks original column src_w[kw, j].
    bt = np.zeros((k * wo, w), np.float32)
    for kw in range(k):
        bt[kw * wo + np.arange(wo), src_w[kw]] = 1.0

    # Row-selection one-hot (kh folded into the weights below).
    asel = np.zeros((k, ho, h), np.float32)
    for kh in range(k):
        asel[kh, np.arange(ho), src_h[kh]] = 1.0

    # Fold conv weights over kh into the row selection, laid out for the transposed
    # (lane-dense) matmul:  ft[t, kw, c*H + h, o*tile_h + r] = sum_kh w[o,c,kh,kw] * A[kh, t*th+r, h]
    ft = jnp.einsum("ocyx,yih->xchoi", weight.astype(jnp.float32), jnp.asarray(asel))
    ft = ft.reshape(k, cin * h, cout, n_t, tile_h)
    ft = jnp.transpose(ft, (3, 0, 1, 2, 4)).reshape(n_t, k, cin * h, cth)

    bias_row = jnp.repeat(bias.astype(jnp.float32), tile_h).reshape(1, cth)

    # Activation relayout: put Cin*H on lanes (a few KB of XLA layout plumbing).
    x_t = jnp.transpose(x, (0, 3, 1, 2)).reshape(n, w, cin * h).astype(jnp.float32)

    kernel = functools.partial(_upsample_conv_kernel, k=k, wo=wo, cth=cth)

    slab = pl.pallas_call(
        kernel,
        out_shape=jax.ShapeDtypeStruct((n, n_t, wo, cth), x.dtype),
        grid_spec=pltpu.PrefetchScalarGridSpec(
            num_scalar_prefetch=0,
            grid=(n, n_t),
            in_specs=[
                # image: constant across row tiles -> no re-DMA between t steps
                pl.BlockSpec((1, w, cin * h), lambda b, t: (b, 0, 0)),
                # stacked column-selection matrix: grid-invariant
                pl.BlockSpec((k * wo, w), lambda b, t: (0, 0)),
                # folded weights: streamed per row tile
                pl.BlockSpec((1, k, cin * h, cth), lambda b, t: (t, 0, 0, 0)),
                # bias row: grid-invariant
                pl.BlockSpec((1, cth), lambda b, t: (0, 0)),
            ],
            out_specs=pl.BlockSpec((1, 1, wo, cth), lambda b, t: (b, t, 0, 0)),
        ),
        compiler_params=pltpu.CompilerParams(
            dimension_semantics=("parallel", "parallel")),
    )(x_t, jnp.asarray(bt), ft, bias_row)

    # NCHW permute of the lane-dense slab (pure XLA layout plumbing).
    out = slab.reshape(n, n_t, wo, cout, tile_h)
    out = jnp.transpose(out, (0, 3, 1, 4, 2)).reshape(n, cout, ho, wo)
    return out


# ------------------------------------- test -------------------------------------------

if __name__ == "__main__":
    def _reference(x, weight, bias, *, kernel_size, stride, upsample):
        if upsample:
            x = jnp.repeat(jnp.repeat(x, upsample, axis=2), upsample, axis=3)
        pad = kernel_size // 2
        x = jnp.pad(x, ((0, 0), (0, 0), (pad, pad), (pad, pad)), mode="reflect")
        out = lax.conv_general_dilated(
            x, weight, window_strides=(stride, stride), padding="VALID",
            dimension_numbers=("NCHW", "OIHW", "NCHW"))
        return out + bias[None, :, None, None]

    key = jax.random.PRNGKey(0)
    kx, kw_, kb = jax.random.split(key, 3)

    in_channels, out_channels, ksize = 4, 8, 3
    x = jax.random.normal(kx, (2, in_channels, 16, 16), dtype=jnp.float32)
    weight = 0.1 * jax.random.normal(kw_, (out_channels, in_channels, ksize, ksize),
                                     dtype=jnp.float32)
    bias = 0.1 * jax.random.normal(kb, (out_channels,), dtype=jnp.float32)

    # Config 1: the typical UpsampleConvLayer usage (upsample=2, stride=1).
    out = upsample_conv_layer(x, weight, bias, kernel_size=ksize, stride=1, upsample=2)
    out = jax.block_until_ready(out)
    ref = _reference(x, weight, bias, kernel_size=ksize, stride=1, upsample=2)
    assert out.shape == ref.shape, (out.shape, ref.shape)
    assert jnp.allclose(out, ref, atol=1e-4, rtol=1e-4), float(jnp.max(jnp.abs(out - ref)))

    # Config 2: stride=2, no upsample — exercises the strided / no-upsample path.
    out2 = upsample_conv_layer(x, weight, bias, kernel_size=ksize, stride=2, upsample=None)
    out2 = jax.block_until_ready(out2)
    ref2 = _reference(x, weight, bias, kernel_size=ksize, stride=2, upsample=None)
    assert out2.shape == ref2.shape, (out2.shape, ref2.shape)
    assert jnp.allclose(out2, ref2, atol=1e-4, rtol=1e-4), float(jnp.max(jnp.abs(out2 - ref2)))

    print("KERNEL_OK")
</pallas_src>

<mosaic_0001>
module attributes {stable_mosaic.version = 11 : i64} {
  func.func @_upsample_conv_kernel(%arg0: i32, %arg1: i32, %arg2: memref<1x16x64xf32, #tpu.memory_space<vmem>>, %arg3: memref<96x16xf32, #tpu.memory_space<vmem>>, %arg4: memref<1x3x64x256xf32, #tpu.memory_space<vmem>>, %arg5: memref<1x256xf32, #tpu.memory_space<vmem>>, %arg6: memref<1x1x32x256xf32, #tpu.memory_space<vmem>>) attributes {dimension_semantics = [#tpu.dimension_semantics<parallel>, #tpu.dimension_semantics<parallel>], iteration_bounds = array<i64: 2, 1>, scalar_prefetch = 0 : i64, scratch_operands = 0 : i64, tpu.core_type = #tpu.core_type<tc>, window_params = [{transform_indices = @transform_0, window_bounds = array<i64: 1, 16, 64>}, {pipeline_mode = #tpu.pipeline_mode<synchronous>, transform_indices = @transform_1, window_bounds = array<i64: 96, 16>}, {transform_indices = @transform_2, window_bounds = array<i64: 1, 3, 64, 256>}, {pipeline_mode = #tpu.pipeline_mode<synchronous>, transform_indices = @transform_3, window_bounds = array<i64: 1, 256>}, {transform_indices = @transform_4, window_bounds = array<i64: 1, 1, 32, 256>}]} {
    %c0 = arith.constant 0 : index
    %c0_0 = arith.constant 0 : index
    %c0_1 = arith.constant 0 : index
    %0 = vector.load %arg2[%c0, %c0_0, %c0_1] : memref<1x16x64xf32, #tpu.memory_space<vmem>>, vector<1x16x64xf32>
    %1 = vector.shape_cast %0 : vector<1x16x64xf32> to vector<16x64xf32>
    %c0_2 = arith.constant 0 : index
    %c0_3 = arith.constant 0 : index
    %2 = vector.load %arg3[%c0_2, %c0_3] : memref<96x16xf32, #tpu.memory_space<vmem>>, vector<96x16xf32>
    %cst = arith.constant dense<0.000000e+00> : vector<96x64xf32>
    %3 = tpu.matmul %2, %1, %cst {dimension_numbers = #tpu.dot_dimension_numbers<[1], [0], [0], [1], [0, 0, 1, 1], [], []>} : vector<96x16xf32>, vector<16x64xf32>, vector<96x64xf32> -> vector<96x64xf32>
    %c0_4 = arith.constant 0 : index
    %c0_5 = arith.constant 0 : index
    %4 = vector.load %arg5[%c0_4, %c0_5] : memref<1x256xf32, #tpu.memory_space<vmem>>, vector<1x256xf32>
    %5 = vector.shape_cast %4 : vector<1x256xf32> to vector<1x256xf32>
    %6 = vector.broadcast %5 : vector<1x256xf32> to vector<32x256xf32>
    %7 = vector.extract_strided_slice %3 {offsets = [0, 0], sizes = [32, 64], strides = [1, 1]} : vector<96x64xf32> to vector<32x64xf32>
    %c0_6 = arith.constant 0 : index
    %c0_7 = arith.constant 0 : index
    %c0_8 = arith.constant 0 : index
    %c0_9 = arith.constant 0 : index
    %8 = vector.load %arg4[%c0_6, %c0_7, %c0_8, %c0_9] : memref<1x3x64x256xf32, #tpu.memory_space<vmem>>, vector<1x1x64x256xf32>
    %9 = vector.shape_cast %8 : vector<1x1x64x256xf32> to vector<64x256xf32>
    %cst_10 = arith.constant dense<0.000000e+00> : vector<32x256xf32>
    %10 = tpu.matmul %7, %9, %cst_10 {dimension_numbers = #tpu.dot_dimension_numbers<[1], [0], [0], [1], [0, 0, 1, 1], [], []>} : vector<32x64xf32>, vector<64x256xf32>, vector<32x256xf32> -> vector<32x256xf32>
    %11 = arith.addf %6, %10 : vector<32x256xf32>
    %12 = vector.extract_strided_slice %3 {offsets = [32, 0], sizes = [32, 64], strides = [1, 1]} : vector<96x64xf32> to vector<32x64xf32>
    %c0_11 = arith.constant 0 : index
    %c1 = arith.constant 1 : index
    %c0_12 = arith.constant 0 : index
    %c0_13 = arith.constant 0 : index
    %13 = vector.load %arg4[%c0_11, %c1, %c0_12, %c0_13] : memref<1x3x64x256xf32, #tpu.memory_space<vmem>>, vector<1x1x64x256xf32>
    %14 = vector.shape_cast %13 : vector<1x1x64x256xf32> to vector<64x256xf32>
    %cst_14 = arith.constant dense<0.000000e+00> : vector<32x256xf32>
    %15 = tpu.matmul %12, %14, %cst_14 {dimension_numbers = #tpu.dot_dimension_numbers<[1], [0], [0], [1], [0, 0, 1, 1], [], []>} : vector<32x64xf32>, vector<64x256xf32>, vector<32x256xf32> -> vector<32x256xf32>
    %16 = arith.addf %11, %15 : vector<32x256xf32>
    %17 = vector.extract_strided_slice %3 {offsets = [64, 0], sizes = [32, 64], strides = [1, 1]} : vector<96x64xf32> to vector<32x64xf32>
    %c0_15 = arith.constant 0 : index
    %c2 = arith.constant 2 : index
    %c0_16 = arith.constant 0 : index
    %c0_17 = arith.constant 0 : index
    %18 = vector.load %arg4[%c0_15, %c2, %c0_16, %c0_17] : memref<1x3x64x256xf32, #tpu.memory_space<vmem>>, vector<1x1x64x256xf32>
    %19 = vector.shape_cast %18 : vector<1x1x64x256xf32> to vector<64x256xf32>
    %cst_18 = arith.constant dense<0.000000e+00> : vector<32x256xf32>
    %20 = tpu.matmul %17, %19, %cst_18 {dimension_numbers = #tpu.dot_dimension_numbers<[1], [0], [0], [1], [0, 0, 1, 1], [], []>} : vector<32x64xf32>, vector<64x256xf32>, vector<32x256xf32> -> vector<32x256xf32>
    %21 = arith.addf %16, %20 : vector<32x256xf32>
    %c0_19 = arith.constant 0 : index
    %c0_20 = arith.constant 0 : index
    %c0_21 = arith.constant 0 : index
    %c0_22 = arith.constant 0 : index
    %22 = vector.load %arg6[%c0_19, %c0_20, %c0_21, %c0_22] : memref<1x1x32x256xf32, #tpu.memory_space<vmem>>, vector<1x1x32x256xf32>
    %23 = vector.shape_cast %22 : vector<1x1x32x256xf32> to vector<32x256xf32>
    %24 = vector.shape_cast %21 : vector<32x256xf32> to vector<1x1x32x256xf32>
    tpu.vector_store %arg6[%c0_19, %c0_20, %c0_21, %c0_22], %24 {strides = array<i32>} : memref<1x1x32x256xf32, #tpu.memory_space<vmem>>, vector<1x1x32x256xf32>,
    return
  }
  func.func @transform_0(%arg0: i32, %arg1: i32) -> (i32, i32, i32) {
    %c0_i32 = arith.constant 0 : i32
    %c0_i32_0 = arith.constant 0 : i32
    %c0_i32_1 = arith.constant 0 : i32
    return %arg0, %c0_i32, %c0_i32_0 : i32, i32, i32
  }
  func.func @transform_1(%arg0: i32, %arg1: i32) -> (i32, i32) {
    %c0_i32 = arith.constant 0 : i32
    %c0_i32_0 = arith.constant 0 : i32
    %c0_i32_1 = arith.constant 0 : i32
    return %c0_i32, %c0_i32_0 : i32, i32
  }
  func.func @transform_2(%arg0: i32, %arg1: i32) -> (i32, i32, i32, i32) {
    %c0_i32 = arith.constant 0 : i32
    %c0_i32_0 = arith.constant 0 : i32
    %c0_i32_1 = arith.constant 0 : i32
    %c0_i32_2 = arith.constant 0 : i32
    return %arg1, %c0_i32, %c0_i32_0, %c0_i32_1 : i32, i32, i32, i32
  }
  func.func @transform_3(%arg0: i32, %arg1: i32) -> (i32, i32) {
    %c0_i32 = arith.constant 0 : i32
    %c0_i32_0 = arith.constant 0 : i32
    %c0_i32_1 = arith.constant 0 : i32
    return %c0_i32, %c0_i32_0 : i32, i32
  }
  func.func @transform_4(%arg0: i32, %arg1: i32) -> (i32, i32, i32, i32) {
    %c0_i32 = arith.constant 0 : i32
    %c0_i32_0 = arith.constant 0 : i32
    %c0_i32_1 = arith.constant 0 : i32
    return %arg0, %arg1, %c0_i32, %c0_i32_0 : i32, i32, i32, i32
  }
}

</mosaic_0001>

<bundles_post_ra>
// kernel: tpu_custom_call.1
= control target key start
LH: loop header
LB: loop body
LE: loop exit
PB: predicated region body
PF: predicated region fallthrough
CT: control target
= control target key end

     0   :  { %9 = vsyncpa [#allocation3], 0  ;;  %s1423_s0 = inlined_call_operand.vmem [shape: f32[2,16,64], index: 0, kind: input, shape index: {}]   ;;  %s1424_s1 = inlined_call_operand.vmem [shape: f32[96,16], index: 1, kind: input, shape index: {}]   ;;  %s1425_s2 = inlined_call_operand.hbm [shape: f32[1,3,64,256], index: 2, kind: input, shape index: {}]   ;;  %s1426_s3 = inlined_call_operand.vmem [shape: f32[1,256], index: 3, kind: input, shape index: {}]   ;;  %s1427_s4 = inlined_call_operand.hbm [shape: f32[2,1,32,256], index: 4, kind: output, shape index: {}]  }
   0x1   :  { %10 = vsyncpa [#allocation4], 0 }
   0x2   :  { %12 = vsyncpa [#allocation4 + $0x1], 0  ;;  %s1198_s15 = smov 0   ;;  %s1200_s16 = smov 0  }
   0x3   :  { %s1202_s17 = smov 0   ;;  %s1204_s18 = smov 0  }
   0x4   :  { %s1206_s19 = smov 0   ;;  %s1208_s20 = smov 0  }
   0x5 LB: > { %s910_s21 = sadd.s32 4294967295, %s1164_s20   ;;  %s911_s22 = sadd.s32 4294967294, %s1164_s20   ;;  %s1164_s20 = sphi %s1208_s20, %s18_s20   ;;  %s1160_s19 = sphi %s1206_s19, %s1436_s19   ;;  %s1156_s18 = sphi %s1204_s18, %s1435_s18   ;;  %s1152_s17 = sphi %s1202_s17, %s1434_s17   ;;  %s1148_s16 = sphi %s1200_s16, %s1433_s16   ;;  %s1144_s15 = sphi %s1198_s15, %s1432_s15  }
   0x6   : > { %s30_s23 = sadd.s32 1, %s1160_s19  ;;  %s133_s24 = sadd.s32 1, %s1152_s17 }
   0x7   : > { %p32_p0 = scmp.ge.s32.totalorder %s30_s23, 2  ;;  %p143_p1 = scmp.ne.s32.totalorder %s1152_s17, %s1148_s16 }
   0x8   : > { %p144_p2 = scmp.eq.s32.totalorder %s910_s21, 1  ;;  %p149_p3 = scmp.ne.s32.totalorder %s1148_s16, %s1144_s15 }
   0x9   : > { %s1438_s23 = smov (%p32_p0, %s30_s23), 0  ;;  %p150_p5 = scmp.eq.s32.totalorder %s911_s22, 1 }
   0xa   : > { %p1238_p4 = por %p144_p2, %p143_p1  ;;  %s128_s26 = ssub.s32 %s1160_s19, %s1438_s23 }
   0xb   : > { %p912_p6 = scmp.ge.s32.totalorder %s1164_s20, 1  ;;  %p131_p7 = scmp.eq.s32.totalorder %s128_s26, 0 }
   0xc   : > { %p1245_p8 = por %p150_p5, %p149_p3  ;;  %p157_p9 = scmp.lt.s32.totalorder %s1164_s20, 3 }
   0xd   : > { %s1251_s28 = scalar_select %p131_p7, %s1152_s17, %s133_s24  }
   0xe   : > { %p1253_p10 = pnand %p912_p6, %p157_p9  ;;  %p1257_p11 = scmp.eq.s32.totalorder %s910_s21, 0 }
   0xf   : > { %s1166_s5 = smov [#allocation2]  }
  0x10   : > { %p993_p12 = pneg %p1253_p10  ;;  %s175_s6 = sshll.u32 %s1166_s5, 4  ;;  %s176_s6 = int_to_ptr.vmem [resolvable:$true] %s175_s6 }
  0x11   : > { %s1069_s7 = scalar_lea.vmem %s176_s6, 6144  ;;  %p1077_p5 = scmp.lt.s32.totalorder %s176_s6, %s176_s6 }
  0x12   : > { %p994_p13 = pnand %p1257_p11, %p993_p12  ;;  %p1070_p1 = scmp.ne.s32.totalorder %s176_s6, %s1069_s7 }
  0x13   : > { %p1078_p6 = scmp.lt.s32.totalorder %s1069_s7, %s1069_s7 }
  0x14   : > { %p1060_p0 = pneg %p994_p13 }
  0x15   : > { %p1079_p7 = por %p1078_p6, %p1077_p5 }
  0x16   : > { %p1072_p2 = pnand %p1070_p1, %p1060_p0 }
  0x18   : > { %p1073_p3 = pneg %p1072_p2 }
  0x1a   : > { %p1080_p9 = pnand %p1079_p7, %p1073_p3 }
  0x1c   : > { %1083 = shalt.err (!%p1080_p9)
}
  0x1d   : > { %s1167_s8 = smov 256   ;;  %s1168_s9 = smov 16  }
  0x1e   : > { %996 = dma.hbm_to_vmem [thread:$0]  (!%p994_p13), %s1425_s2, 6144, %s176_s6, [#allocation3], %s1167_s8, %s1167_s8, %s1168_s9  }
  0x1f   : > { %202 = sbr.rel (%p1253_p10) target bundleno = 482 (0x1e2), region = 36 }
  0x24   : > { %1135 = dma.done.wait (%p1257_p11), [#allocation3], 6144  }
  0x25   : > { %1137 = vsyncadd (%p1257_p11), [#allocation3], 4294961152  ;;  %p228_p12 = scmp.lt.s32.totalorder %s1156_s18, 1  ;;  %vm247_vm0 = vcmask 130048   ;;  %v235_v2 = vld [vmem:[%s1424_s1] sm:$0xff]  ;;  %v236_v3 = vld [vmem:[%s1424_s1 + $0x8] sm:$0xff] }
  0x26   : > { %969 = vmatprep.mubr.msk.f32.mxu0 %vm247_vm0, %v235_v2  ;;  %v237_v4 = vld [vmem:[%s1424_s1 + $0x10] sm:$0xff]  ;;  %v436_v5 = vld [vmem:[#allocation2 + $0x78] sm:$0xff]  ;;  %v434_v7 = vld [vmem:[#allocation2 + $0x68] sm:$0xff]  ;;  %v1169_v38 = vmov 0.0   ;;  %vm437_vm1 = vcmask 523264   ;;  %s225_s11 = sand.u32 1, %s1148_s16  }
  0x27   : > { %s229_s12 = scalar_select %p228_p12, %s1156_s18, 1  ;;  %466 = vmatprep.subr.mxu1 %v436_v5  ;;  %v435_v6 = vld [vmem:[#allocation2 + $0x70] sm:$0xff]  ;;  %v433_v8 = vld [vmem:[#allocation2 + $0x60] sm:$0xff]  ;;  %v238_v9 = vld [vmem:[%s1424_s1 + $0x18] sm:$0xff]  ;;  %514 = vmatprep.mubr.f32.mxu1 %v1169_v38 }
  0x28   : > { %467 = vmatpush1.msra.mxu1 %v435_v6  ;;  %v432_v10 = vld [vmem:[#allocation2 + $0x58] sm:$0xff]  ;;  %v239_v11 = vld [vmem:[%s1424_s1 + $0x20] sm:$0xff]  ;;  %v431_v12 = vld [vmem:[#allocation2 + $0x50] sm:$0xff]  ;;  %s950_s21 = sshll.u32 %s1156_s18, 10  ;;  %s1378_s29 = scalar_lea.sflag [#allocation4], %s225_s11 }
  0x29   : > { %s949_s13 = sshll.u32 %s229_s12, 4  ;;  %468 = vmatprep.subr.mxu1 %v434_v7  ;;  %v563_v13 = vld [vmem:[#allocation2 + $0xf8] sm:$0xff]  ;;  %v430_v14 = vld [vmem:[#allocation2 + $0x48] sm:$0xff]  ;;  %v562_v15 = vld [vmem:[#allocation2 + $0xf0] sm:$0xff]  ;;  %s917_s12 = sshll.u32 %s225_s11, 6 }
  0x2a   : > { %s232_s22 = scalar_lea.vmem %s1423_s0, %s949_s13  ;;  %469 = vmatpush1.msra.mxu1 %v433_v8  ;;  %v429_v16 = vld [vmem:[#allocation2 + $0x40] sm:$0xff]  ;;  %v561_v17 = vld [vmem:[#allocation2 + $0xe8] sm:$0xff]  ;;  %v428_v19 = vld [vmem:[#allocation2 + $0x38] sm:$0xff]  ;;  %s1357_s13 = scalar_lea.vmem [#allocation5], %s917_s12 }
  0x2b   : > { %v234_v0 = vld [vmem:[%s232_s22 + $0x8] sm:$0xff]  ;;  %v233_v1 = vld [vmem:[%s232_s22] sm:$0xff]  ;;  %470 = vmatprep.subr.mxu1 %v432_v10  ;;  %v241_v20 = vld [vmem:[%s1424_s1 + $0x30] sm:$0xff]  ;;  %s823_s14 = sshll.u32 %s1357_s13, 4  ;;  %s1373_s26 = scalar_lea.hbm %s1427_s4, %s950_s21  ;;  %s1367_s14 = int_to_ptr.vmem [resolvable:$true] %s823_s14 }
  0x2c   : > { %965 = vmatprep.subr.mxu0 %v234_v0  ;;  %v240_v18 = vld [vmem:[%s1424_s1 + $0x28] sm:$0xff]  ;;  %471 = vmatpush1.msra.mxu1 %v431_v12  ;;  %v427_v21 = vld [vmem:[#allocation2 + $0x30] sm:$0xff]  ;;  %v560_v23 = vld [vmem:[#allocation2 + $0xe0] sm:$0xff]  ;;  %s1084_s18 = scalar_lea.vmem %s1367_s14, 1024  ;;  %s1170_s30 = smov [#allocation5]  }
  0x2d   : > { %966 = vmatpush3.msra.mxu0 %v234_v0  ;;  %472 = vmatprep.subr.mxu1 %v430_v14  ;;  %v426_v22 = vld [vmem:[#allocation2 + $0x28] sm:$0xff]  ;;  %v425_v24 = vld [vmem:[#allocation2 + $0x20] sm:$0xff]  ;;  %v559_v25 = vld [vmem:[#allocation2 + $0xd8] sm:$0xff]  ;;  %p1085_p10 = scmp.ne.s32.totalorder %s1367_s14, %s1084_s18  ;;  %s1088_s5 = sshll.u32 %s1170_s30, 4  ;;  %s1089_s5 = int_to_ptr.vmem [resolvable:$false] %s1088_s5 }
  0x2e   : > { %967 = vmatprep.subr.mxu0 %v233_v1  ;;  %473 = vmatpush1.msra.mxu1 %v429_v16  ;;  %v242_v26 = vld [vmem:[%s1424_s1 + $0x38] sm:$0xff]  ;;  %v243_v28 = vld [vmem:[%s1424_s1 + $0x40] sm:$0xff]  ;;  %v423_v29 = vld [vmem:[#allocation2 + $0x10] sm:$0xff]  ;;  %s1090_s6 = scalar_lea.vmem %s1089_s5, 2048  ;;  %p1091_p0 = scmp.lt.s32.totalorder %s1367_s14, %s1089_s5 }
  0x2f   : > { %968 = vmatpush3.msra.mxu0 %v233_v1  ;;  %474 = vmatprep.subr.mxu1 %v428_v19  ;;  %v424_v27 = vld [vmem:[#allocation2 + $0x18] sm:$0xff]  ;;  %v558_v30 = vld [vmem:[#allocation2 + $0xd0] sm:$0xff]  ;;  %v244_v31 = vld [vmem:[%s1424_s1 + $0x48] sm:$0xff]  ;;  %p1086_p11 = pnand %p1085_p10, %p1238_p4  ;;  %p1092_p1 = scmp.lt.s32.totalorder %s1090_s6, %s1084_s18 }
  0x30   : > { %970 = vmatmul.mubr.msk.f32.vlgmr.msra.gmra.mxu0 %vm247_vm0, %v236_v3  ;;  %592 = vmatprep.subr.mxu0 %v563_v13  ;;  %v245_v32 = vld [vmem:[%s1424_s1 + $0x50] sm:$0xff]  ;;  %v246_v33 = vld [vmem:[%s1424_s1 + $0x58] sm:$0xff]  ;;  %v422_v34 = vld [vmem:[#allocation2 + $0x8] sm:$0xff] }
  0x31   : > { %972 = vmatprep.mubr.msk.f32.mxu0 %vm247_vm0, %v237_v4  ;;  %593 = vmatpush1.msra.mxu0 %v562_v15  ;;  %v421_v35 = vld [vmem:[#allocation2] sm:$0xff]  ;;  %v557_v36 = vld [vmem:[#allocation2 + $0xc8] sm:$0xff]  ;;  %v689_v39 = vld [vmem:[#allocation2 + $0x178] sm:$0xff]  ;;  %p1087_p13 = pneg %p1086_p11  ;;  %p1093_p2 = por %p1092_p1, %p1091_p0 }
  0x32   : > { %594 = vmatprep.subr.mxu0 %v561_v17  ;;  %475 = vmatpush1.msra.mxu1 %v427_v21  ;;  %v556_v37 = vld [vmem:[#allocation2 + $0xc0] sm:$0xff]  ;;  %v555_v40 = vld [vmem:[#allocation2 + $0xb8] sm:$0xff]  ;;  %v554_v41 = vld [vmem:[#allocation2 + $0xb0] sm:$0xff] }
  0x33   : > { %476 = vmatprep.subr.mxu1 %v426_v22  ;;  %595 = vmatpush1.msra.mxu0 %v560_v23  ;;  %v553_v42 = vld [vmem:[#allocation2 + $0xa8] sm:$0xff]  ;;  %v552_v43 = vld [vmem:[#allocation2 + $0xa0] sm:$0xff]  ;;  %v551_v44 = vld [vmem:[#allocation2 + $0x98] sm:$0xff]  ;;  %p1094_p3 = pnand %p1093_p2, %p1087_p13 }
  0x34   : > { %973 = vmatmul.mubr.msk.f32.gmra.mxu0 %vm247_vm0, %v238_v9  ;;  %477 = vmatpush1.msra.mxu1 %v425_v24  ;;  %v550_v45 = vld [vmem:[#allocation2 + $0x90] sm:$0xff]  ;;  %v549_v46 = vld [vmem:[#allocation2 + $0x88] sm:$0xff]  ;;  %v548_v47 = vld [vmem:[#allocation2 + $0x80] sm:$0xff] }
  0x35   : > { %975 = vmatprep.mubr.msk.f32.mxu0 %vm247_vm0, %v239_v11  ;;  %596 = vmatprep.subr.mxu0 %v559_v25  ;;  %v688_v49 = vld [vmem:[#allocation2 + $0x170] sm:$0xff]  ;;  %v687_v51 = vld [vmem:[#allocation2 + $0x168] sm:$0xff]  ;;  %v686_v52 = vld [vmem:[#allocation2 + $0x160] sm:$0xff]  ;;  %v411_v11 = vlaneseq }
  0x36   : > { %478 = vmatprep.subr.mxu1 %v424_v27  ;;  %597 = vmatpush1.msra.mxu0 %v558_v30  ;;  %v685_v54 = vld [vmem:[#allocation2 + $0x158] sm:$0xff]  ;;  %v684_v55 = vld [vmem:[#allocation2 + $0x150] sm:$0xff]  ;;  %v683_v57 = vld [vmem:[#allocation2 + $0x148] sm:$0xff] }
  0x37   : > { %479 = vmatpush1.msra.mxu1 %v423_v29  ;;  %598 = vmatprep.subr.mxu0 %v557_v36  ;;  %v682_v58 = vld [vmem:[#allocation2 + $0x140] sm:$0xff]  ;;  %v681_v60 = vld [vmem:[#allocation2 + $0x138] sm:$0xff]  ;;  %v680_v61 = vld [vmem:[#allocation2 + $0x130] sm:$0xff]  ;;  %v412_v13 = vshrl.u32 %v411_v11, 7 }
  0x38   : > { %976 = vmatmul.mubr.msk.f32.gmra.mxu0 %vm247_vm0, %v240_v18  ;;  %480 = vmatprep.subr.mxu1 %v422_v34  ;;  %v679_v63 = vld [vmem:[#allocation2 + $0x128] sm:$0xff]  ;;  %v678_v0 = vld [vmem:[#allocation2 + $0x120] sm:$0xff]  ;;  %v677_v2 = vld [vmem:[#allocation2 + $0x118] sm:$0xff] }
  0x39   : > { %978 = vmatprep.mubr.msk.f32.mxu0 %vm247_vm0, %v241_v20  ;;  %481 = vmatpush1.msra.mxu1 %v421_v35  ;;  %v676_v3 = vld [vmem:[#allocation2 + $0x110] sm:$0xff]  ;;  %v675_v5 = vld [vmem:[#allocation2 + $0x108] sm:$0xff]  ;;  %v674_v6 = vld [vmem:[#allocation2 + $0x100] sm:$0xff]  ;;  %v413_v16 = vsub.s32 0, %v412_v13  ;;  %v417_v19 = vsub.s32 1, %v412_v13 }
  0x3a   : > { %599 = vmatpush1.msra.mxu0 %v556_v37  ;;  %718 = vmatprep.subr.mxu1 %v689_v39  ;;  %v409_v17 = vld [vmem:[%s1426_s3] sm:$0x3] }
  0x3b   : > { %600 = vmatprep.subr.mxu0 %v555_v40  ;;  %v414_v21 = vrot.slane %v409_v17, %v413_v16  ;;  %v418_v24 = vrot.slane %v409_v17, %v417_v19 }
  0x3c   : > { %979 = vmatmul.mubr.msk.f32.gmra.mxu0 %vm247_vm0, %v242_v26 }
  0x3d   : > { %981 = vmatprep.mubr.msk.f32.mxu0 %vm247_vm0, %v243_v28  ;;  %601 = vmatpush1.msra.mxu0 %v554_v41 }
  0x3e   : > { %602 = vmatprep.subr.mxu0 %v553_v42 }
  0x3f   : > { %603 = vmatpush1.msra.mxu0 %v552_v43 }
  0x40   : > { %982 = vmatmul.mubr.msk.f32.gmra.mxu0 %vm247_vm0, %v244_v31  ;;  %604 = vmatprep.subr.mxu0 %v551_v44 }
  0x41   : > { %984 = vmatprep.mubr.msk.f32.mxu0 %vm247_vm0, %v245_v32  ;;  %605 = vmatpush1.msra.mxu0 %v550_v45 }
  0x42   : > { %606 = vmatprep.subr.mxu0 %v549_v46 }
  0x43   : > { %607 = vmatpush1.msra.mxu0 %v548_v47 }
  0x44   : > { %985 = vmatmul.mubr.msk.f32.gmra.mxu0 %vm247_vm0, %v246_v33 }
  0x45   : > { %640 = vmatprep.mubr.f32.mxu0 %v1169_v38 }
  0xf0   : > { %v971_v48 = vpop.f32.mrf.mxu0 }
  0xf2   : > { %v350_v50 = vpop.f32.mrf.mxu0 }
  0xf3   : > { %932 = vmatmul.mubr.msk.f32.vlgmr.msra.gmra.mxu1 %vm437_vm1, %v350_v50 }
  0xf4   : > { %719 = vmatpush1.msra.mxu1 %v688_v49  ;;  %v974_v53 = vpop.f32.mrf.mxu0  ;;  %520 = vmatprep.mubr.f32.mxu1 %v1169_v38 }
  0xf5   : > { %720 = vmatprep.subr.mxu1 %v687_v51 }
  0xf6   : > { %721 = vmatpush1.msra.mxu1 %v686_v52  ;;  %v360_v56 = vpop.f32.mrf.mxu0 }
  0xf7   : > { %722 = vmatprep.subr.mxu1 %v685_v54  ;;  %933 = vmatmul.mubr.msk.f32.gmra.mxu1 %vm437_vm1, %v971_v48 }
  0xf8   : > { %723 = vmatpush1.msra.mxu1 %v684_v55  ;;  %v977_v59 = vpop.f32.mrf.mxu0  ;;  %526 = vmatprep.mubr.f32.mxu1 %v1169_v38 }
  0xf9   : > { %724 = vmatprep.subr.mxu1 %v683_v57 }
  0xfa   : > { %725 = vmatpush1.msra.mxu1 %v682_v58  ;;  %v370_v62 = vpop.f32.mrf.mxu0 }
  0xfb   : > { %726 = vmatprep.subr.mxu1 %v681_v60  ;;  %934 = vmatmul.mubr.msk.f32.gmra.mxu1 %vm437_vm1, %v360_v56 }
  0xfc   : > { %936 = vmatmul.mubr.msk.f32.vlgmr.msra.gmra.mxu0 %vm437_vm1, %v370_v62  ;;  %727 = vmatpush1.msra.mxu1 %v680_v61  ;;  %v980_v1 = vpop.f32.mrf.mxu0 }
  0xfd   : > { %728 = vmatprep.subr.mxu1 %v679_v63  ;;  %532 = vmatprep.mubr.f32.mxu1 %v1169_v38 }
  0xfe   : > { %729 = vmatpush1.msra.mxu1 %v678_v0  ;;  %v380_v4 = vpop.f32.mrf.mxu0  ;;  %646 = vmatprep.mubr.f32.mxu0 %v1169_v38 }
  0xff   : > { %730 = vmatprep.subr.mxu1 %v677_v2  ;;  %935 = vmatmul.mubr.msk.f32.gmra.mxu1 %vm437_vm1, %v974_v53 }
 0x100   : > { %937 = vmatmul.mubr.msk.f32.gmra.mxu0 %vm437_vm1, %v977_v59  ;;  %731 = vmatpush1.msra.mxu1 %v676_v3  ;;  %v983_v7 = vpop.f32.mrf.mxu0 }
 0x101   : > { %732 = vmatprep.subr.mxu1 %v675_v5  ;;  %652 = vmatprep.mubr.f32.mxu0 %v1169_v38 }
 0x102   : > { %733 = vmatpush1.msra.mxu1 %v674_v6  ;;  %v390_v8 = vpop.f32.mrf.mxu0  ;;  %766 = vmatprep.mubr.f32.mxu1 %v1169_v38 }
 0x103   : > { %940 = vmatmul.mubr.msk.f32.vlgmr.msra.gmra.mxu1 %vm437_vm1, %v390_v8 }
 0x104   : > { %938 = vmatmul.mubr.msk.f32.gmra.mxu0 %vm437_vm1, %v380_v4  ;;  %772 = vmatprep.mubr.f32.mxu1 %v1169_v38  ;;  %v986_v9 = vpop.f32.mrf.mxu0 }
 0x105   : > { %658 = vmatprep.mubr.f32.mxu0 %v1169_v38 }
 0x106   : > { %v400_v10 = vpop.f32.mrf.mxu0 }
 0x107   : > { %941 = vmatmul.mubr.msk.f32.gmra.mxu1 %vm437_vm1, %v983_v7 }
 0x108   : > { %939 = vmatmul.mubr.msk.f32.gmra.mxu0 %vm437_vm1, %v980_v1  ;;  %778 = vmatprep.mubr.f32.mxu1 %v1169_v38 }
 0x10b   : > { %942 = vmatmul.mubr.msk.f32.gmra.mxu1 %vm437_vm1, %v400_v10 }
 0x10c   : > { %784 = vmatprep.mubr.f32.mxu1 %v1169_v38 }
 0x10f   : > { %943 = vmatmul.mubr.msk.f32.gmra.mxu1 %vm437_vm1, %v986_v9 }
 0x1b3   : > { %v516_v12 = vpop.f32.mrf.mxu1 }
 0x1b4   : > { %v539_v27 = vadd.f32 %v516_v12, %v414_v21 }
 0x1b5   : > { %v518_v14 = vpop.f32.mrf.mxu1 }
 0x1b6   : > { %v540_v30 = vadd.f32 %v518_v14, %v418_v24 }
 0x1b7   : > { %v522_v15 = vpop.f32.mrf.mxu1 }
 0x1b8   : > { %v541_v34 = vadd.f32 %v522_v15, %v414_v21 }
 0x1b9   : > { %v524_v18 = vpop.f32.mrf.mxu1 }
 0x1ba   : > { %v542_v39 = vadd.f32 %v524_v18, %v418_v24 }
 0x1bb   : > { %v528_v20 = vpop.f32.mrf.mxu1 }
 0x1bc   : > { %v642_v22 = vpop.f32.mrf.mxu0  ;;  %v543_v44 = vadd.f32 %v528_v20, %v414_v21 }
 0x1bd   : > { %v530_v23 = vpop.f32.mrf.mxu1  ;;  %v665_v31 = vadd.f32 %v642_v22, %v539_v27 }
 0x1be   : > { %v644_v25 = vpop.f32.mrf.mxu0  ;;  %v544_v49 = vadd.f32 %v530_v23, %v418_v24 }
 0x1bf   : > { %v534_v26 = vpop.f32.mrf.mxu1  ;;  %v666_v35 = vadd.f32 %v644_v25, %v540_v30 }
 0x1c0   : > { %v648_v28 = vpop.f32.mrf.mxu0  ;;  %v545_v53 = vadd.f32 %v534_v26, %v414_v21 }
 0x1c1   : > { %v536_v29 = vpop.f32.mrf.mxu1  ;;  %v667_v40 = vadd.f32 %v648_v28, %v541_v34 }
 0x1c2   : > { %v650_v32 = vpop.f32.mrf.mxu0  ;;  %v546_v58 = vadd.f32 %v536_v29, %v418_v24 }
 0x1c3   : > { %v768_v33 = vpop.f32.mrf.mxu1  ;;  %v668_v45 = vadd.f32 %v650_v32, %v542_v39 }
 0x1c4   : > { %v654_v36 = vpop.f32.mrf.mxu0  ;;  %v791_v37 = vadd.f32 %v768_v33, %v665_v31 }
 0x1c5   : > { %v770_v38 = vpop.f32.mrf.mxu1  ;;  %v669_v50 = vadd.f32 %v654_v36, %v543_v44 }
 0x1c6   : > { %799 = vst [vmem:[%s1357_s13] sm:$0xff] %v791_v37  ;;  %v656_v41 = vpop.f32.mrf.mxu0  ;;  %v792_v42 = vadd.f32 %v770_v38, %v666_v35 }
 0x1c7   : > { %v774_v43 = vpop.f32.mrf.mxu1  ;;  %v670_v54 = vadd.f32 %v656_v41, %v544_v49 }
 0x1c8   : > { %800 = vst [vmem:[%s1357_s13 + $0x8] sm:$0xff] %v792_v42  ;;  %v793_v46 = vadd.f32 %v774_v43, %v667_v40  ;;  %v660_v47 = vpop.f32.mrf.mxu0 }
 0x1c9   : > { %v776_v48 = vpop.f32.mrf.mxu1  ;;  %v671_v59 = vadd.f32 %v660_v47, %v545_v53 }
 0x1ca   : > { %801 = vst [vmem:[%s1357_s13 + $0x10] sm:$0xff] %v793_v46  ;;  %v794_v51 = vadd.f32 %v776_v48, %v668_v45  ;;  %v662_v56 = vpop.f32.mrf.mxu0 }
 0x1cb   : > { %v780_v52 = vpop.f32.mrf.mxu1  ;;  %v672_v62 = vadd.f32 %v662_v56, %v546_v58 }
 0x1cc   : > { %802 = vst [vmem:[%s1357_s13 + $0x18] sm:$0xff] %v794_v51  ;;  %v795_v55 = vadd.f32 %v780_v52, %v669_v50 }
 0x1cd   : > { %v782_v57 = vpop.f32.mrf.mxu1 }
 0x1ce   : > { %803 = vst [vmem:[%s1357_s13 + $0x20] sm:$0xff] %v795_v55  ;;  %v796_v60 = vadd.f32 %v782_v57, %v670_v54 }
 0x1cf   : > { %v786_v61 = vpop.f32.mrf.mxu1 }
 0x1d0   : > { %804 = vst [vmem:[%s1357_s13 + $0x28] sm:$0xff] %v796_v60  ;;  %v797_v63 = vadd.f32 %v786_v61, %v671_v59 }
 0x1d1   : > { %v788_v0 = vpop.f32.mrf.mxu1 }
 0x1d2   : > { %805 = vst [vmem:[%s1357_s13 + $0x30] sm:$0xff] %v797_v63  ;;  %v798_v1 = vadd.f32 %v788_v0, %v672_v62 }
 0x1d4   : > { %806 = vst [vmem:[%s1357_s13 + $0x38] sm:$0xff] %v798_v1 }
 0x1d5   : > { %1097 = shalt.err (!%p1094_p3)
}
 0x1d6   : > { %s1098_s7 = scalar_lea.hbm %s1373_s26, 1024  ;;  %s1102_s10 = scalar_lea.hbm %s1427_s4, 2048 }
 0x1d7   : > { %p1099_p5 = scmp.ne.s32.totalorder %s1373_s26, %s1098_s7  ;;  %p1103_p9 = scmp.lt.s32.totalorder %s1373_s26, %s1427_s4 }
 0x1d8   : > { %p1104_p12 = scmp.lt.s32.totalorder %s1102_s10, %s1098_s7 }
 0x1d9   : > { %p1100_p6 = pnand %p1099_p5, %p1238_p4 }
 0x1da   : > { %p1105_p10 = por %p1104_p12, %p1103_p9 }
 0x1db   : > { %p1101_p7 = pneg %p1100_p6 }
 0x1dd   : > { %p1106_p11 = pnand %p1105_p10, %p1101_p7 }
 0x1df   : > { %1109 = shalt.err (!%p1106_p11)
}
 0x1e0   : > { %s1171_s13 = smov 256   ;;  %s1172_s21 = smov 16  }
 0x1e1   : > { %991 = dma.vmem_to_hbm [thread:$0]  (%p1238_p4), %s1367_s14, 1024, %s1373_s26, %s1378_s29, %s1171_s13, %s1171_s13, %s1172_s21  }
 0x1e2 PF: > { %p1003_p13 = scmp.ge.s32.totalorder %s1164_s20, 2  ;;  %s838_s22 = sand.u32 1, %s1144_s15  }
 0x1e3   : > { %s839_s24 = scalar_lea.sflag [#allocation4], %s838_s22 }
 0x1e4   : > { %p998_p0 = pnand %p1003_p13, %p1245_p8 }
 0x1e6   : > { %p999_p1 = pneg %p998_p0 }
 0x1e8   : > { %1139 = dma.done.wait (%p999_p1), %s839_s24, 1024  }
 0x1e9   : > { %1141 = vsyncadd (%p999_p1), %s839_s24, 4294966272  ;;  %s18_s20 = sadd.s32 1, %s1164_s20   ;;  %s1432_s15 = smov %s1148_s16 }
 0x1ea   : > { %p15_p2 = scmp.ge.s32.totalorder %s18_s20, 4   ;;  %s1433_s16 = smov %s1152_s17 }
 0x1eb   : > { %s1434_s17 = smov %s1251_s28  ;;  %s1435_s18 = smov %s1160_s19 }
 0x1ec   : > { %s1436_s19 = smov %s1438_s23  ;;  %17 = sbr.rel (!%p15_p2) target bundleno = 5 (0x5), region = 79 }
 0x1f1   :  { %844 = vsyncpa [#allocation3], 1 }
 0x1f2   :  { %846 = vsyncpa [#allocation3 + $0x1], 1 }
 0x1f3   :  { %847 = vsyncpa [#allocation4], 1 }
 0x1f4   :  { %849 = vsyncpa [#allocation4 + $0x1], 1 }

</bundles_post_ra>
